<compile_context>
chip_gen: v6e
topology: v6e:2x2x1
jax: 0.10.0
libtpu: 0.0.40
codegen_flags: <defaults>
</compile_context>

<pallas_src>
import math
from functools import partial

import jax
import jax.numpy as jnp
from jax import lax
from jax.experimental import pallas as pl
from jax.experimental.pallas import tpu as pltpu

# ----------------------------- model config (small) -----------------------------
IMG_SIZE = 16
PATCH = 4
IN_CHANS = 4
EMBED_DIM = 32
DEPTH = 3
NUM_CLASSES = 8
MLP_RATIO = 4
LN_EPS = 1e-5

NUM_PATCHES = (IMG_SIZE // PATCH) ** 2          # 16
SEQ_LEN = NUM_PATCHES + 1                       # 17 (cls token)
HIDDEN = EMBED_DIM * MLP_RATIO                  # 128
HEAD_PAD = 128                                  # lane-dense padded head output width
assert HIDDEN == HEAD_PAD                       # lets b1 / head_b share one 128-lane slab

_INV_SQRT2 = 1.0 / math.sqrt(2.0)


# ----------------------------- in-kernel math helpers -----------------------------
def _gelu_exact(x):
    # PyTorch nn.GELU() default: exact erf formulation (f32 VPU polynomial).
    return 0.5 * x * (1.0 + lax.erf(x * _INV_SQRT2))


def _layernorm(x):
    # Affine (gamma/beta) is folded into the following Linear in the wrapper.
    mean = jnp.mean(x, axis=-1, keepdims=True)
    xm = x - mean
    var = jnp.mean(xm * xm, axis=-1, keepdims=True)
    return xm * lax.rsqrt(var + LN_EPS)


# ----------------------------- fused kernel -----------------------------
def vit_fused_kernel(
    patches_ref,        # (cls_rows + B*N, C*P*P) bf16, first cls_rows rows are zero
    patch_w_ref,        # (C*P*P, D) bf16
    vec32_ref,          # (n_rows + DEPTH, D) f32: [cls+pos0 (x cls_rows); pos[1:]+conv_b (tiled B); b2 per block]
    vec128_ref,         # (DEPTH + 1, 128) f32: [b1' per block; head_b' padded]
    w1_ref,             # (DEPTH, D, 4D) bf16, LN gamma folded
    w2_ref,             # (DEPTH, 4D, D) bf16
    head_w_ref,         # (D, 128) bf16, final-norm gamma folded, zero-padded lanes
    out_ref,            # (cls_rows, 128) f32
    *, n_rows, cls_rows,
):
    f32 = jnp.float32

    # Patch embedding (stride-P conv as one bf16 MXU matmul) + cls/pos/bias add:
    # one matmul + one dense add assembles the whole (n_rows, D) sequence.
    x = (jnp.dot(patches_ref[...], patch_w_ref[...], preferred_element_type=f32)
         + vec32_ref[0:n_rows, :])

    # DEPTH x (LayerNorm[affine folded] -> Linear(D,4D) -> GELU -> Linear(4D,D)).
    # No residual / attention, matching the nn.Sequential blocks in the spec.
    # Activations stay register-resident for the whole loop (few vregs at this size).
    for d in range(DEPTH):
        xn = _layernorm(x)
        h = (jnp.dot(xn.astype(jnp.bfloat16), w1_ref[d], preferred_element_type=f32)
             + vec128_ref[d:d + 1, :])
        h = _gelu_exact(h)
        x = (jnp.dot(h.astype(jnp.bfloat16), w2_ref[d], preferred_element_type=f32)
             + vec32_ref[n_rows + d:n_rows + d + 1, :])

    # Final LayerNorm (affine folded into head) + classification head on the CLS
    # rows only (static, sublane-aligned slice).  Store is a dense (8,128) tile.
    xn = _layernorm(x[0:cls_rows, :])
    out_ref[...] = (jnp.dot(xn.astype(jnp.bfloat16), head_w_ref[...],
                            preferred_element_type=f32)
                    + vec128_ref[DEPTH:DEPTH + 1, :])


# ----------------------------- pallas_call wrapper -----------------------------
def _spec(shape):
    nd = len(shape)
    return pl.BlockSpec(shape, lambda i, _nd=nd: (0,) * _nd)


def _vit_pallas(patches, patch_w, vec32, vec128, w1, w2, head_w, *, n_rows, cls_rows):
    args = (patches, patch_w, vec32, vec128, w1, w2, head_w)
    return pl.pallas_call(
        partial(vit_fused_kernel, n_rows=n_rows, cls_rows=cls_rows),
        out_shape=jax.ShapeDtypeStruct((cls_rows, HEAD_PAD), jnp.float32),
        grid=(1,),
        in_specs=[_spec(a.shape) for a in args],
        out_specs=_spec((cls_rows, HEAD_PAD)),
        compiler_params=pltpu.CompilerParams(dimension_semantics=("arbitrary",)),
    )(*args)


# ----------------------------- parameter init (PyTorch-faithful layout) -----------------------------
def trunc_normal(key, shape, std=0.02):
    return std * jax.random.truncated_normal(key, -2.0, 2.0, shape, jnp.float32)


def init_params(key):
    D, C, P, H, S = EMBED_DIM, IN_CHANS, PATCH, HIDDEN, SEQ_LEN
    ks = jax.random.split(key, 5 + 2 * DEPTH)
    fan_in = C * P * P
    bound = 1.0 / math.sqrt(fan_in)          # Conv2d default (kaiming-uniform-style) bound

    w1 = jnp.stack([trunc_normal(ks[4 + 2 * i], (D, H)) for i in range(DEPTH)])
    w2 = jnp.stack([trunc_normal(ks[5 + 2 * i], (H, D)) for i in range(DEPTH)])

    return {
        "conv_w": jax.random.uniform(ks[0], (D, C, P, P), jnp.float32, -bound, bound),
        "conv_b": jax.random.uniform(ks[1], (D,), jnp.float32, -bound, bound),
        "cls_token": trunc_normal(ks[2], (1, 1, D)),
        "pos_embed": trunc_normal(ks[3], (1, S, D)),
        "ln_w": jnp.ones((DEPTH, D), jnp.float32),
        "ln_b": jnp.zeros((DEPTH, D), jnp.float32),
        "w1": w1,                                   # (DEPTH, D, 4D), stored (in, out)
        "b1": jnp.zeros((DEPTH, H), jnp.float32),
        "w2": w2,                                   # (DEPTH, 4D, D)
        "b2": jnp.zeros((DEPTH, D), jnp.float32),
        "norm_w": jnp.ones((D,), jnp.float32),
        "norm_b": jnp.zeros((D,), jnp.float32),
        "head_w": trunc_normal(ks[4 + 2 * DEPTH], (D, NUM_CLASSES)),
        "head_b": jnp.zeros((NUM_CLASSES,), jnp.float32),
    }


# ----------------------------- forward (jitted end-to-end) -----------------------------
@jax.jit
def vit_forward(x, params):
    B, C, Hi, Wi = x.shape
    P = PATCH
    Hp, Wp = Hi // P, Wi // P
    N = Hp * Wp
    D = EMBED_DIM
    cls_rows = -(-B // 8) * 8                # sublane-aligned CLS block (>= batch)
    n_rows = cls_rows + B * N

    # patchify: (B,C,H,W) -> (B*N, C*P*P), matching conv(stride=P) + flatten(2).transpose(1,2);
    # prepend cls_rows zero rows so the kernel assembles the sequence with one dense add.
    patches = (x.reshape(B, C, Hp, P, Wp, P)
                 .transpose(0, 2, 4, 1, 3, 5)
                 .reshape(B * N, C * P * P))
    patches = jnp.pad(patches, ((cls_rows, 0), (0, 0))).astype(jnp.bfloat16)

    patch_w = params["conv_w"].reshape(D, C * P * P).T.astype(jnp.bfloat16)

    # Fold LayerNorm affine into the following Linear (per block, and final norm -> head).
    w1 = (params["ln_w"][:, :, None] * params["w1"]).astype(jnp.bfloat16)
    b1 = params["b1"] + jnp.einsum("kd,kdh->kh", params["ln_b"], params["w1"])
    w2 = params["w2"].astype(jnp.bfloat16)

    head_w = jnp.zeros((D, HEAD_PAD), jnp.float32)
    head_w = head_w.at[:, :NUM_CLASSES].set(params["norm_w"][:, None] * params["head_w"])
    head_w = head_w.astype(jnp.bfloat16)
    head_b = jnp.zeros((HEAD_PAD,), jnp.float32)
    head_b = head_b.at[:NUM_CLASSES].set(params["head_b"] + params["norm_b"] @ params["head_w"])

    # Packed f32 vector slabs (collapses many tiny DMAs into two).
    pos = params["pos_embed"][0]                               # (S, D)
    cls_pos = params["cls_token"][0, 0] + pos[0]               # (D,)
    pos_bias = pos[1:] + params["conv_b"][None, :]             # (N, D) = pos_embed + conv bias
    add_slab = jnp.concatenate(
        [jnp.broadcast_to(cls_pos, (cls_rows, D)), jnp.tile(pos_bias, (B, 1))], axis=0)
    vec32 = jnp.concatenate([add_slab, params["b2"]], axis=0)  # (n_rows + DEPTH, D)
    vec128 = jnp.concatenate([b1, head_b[None, :]], axis=0)    # (DEPTH + 1, 128)

    out_pad = _vit_pallas(patches, patch_w, vec32, vec128, w1, w2, head_w,
                          n_rows=n_rows, cls_rows=cls_rows)
    return out_pad[:B, :NUM_CLASSES]


# ----------------------------- main -----------------------------
if __name__ == "__main__":
    key = jax.random.PRNGKey(0)
    k_params, k_x = jax.random.split(key)
    params = init_params(k_params)

    x = jax.random.normal(k_x, (2, IN_CHANS, IMG_SIZE, IMG_SIZE), jnp.float32)

    out = vit_forward(x, params)
    out = jax.block_until_ready(out)
    assert out.shape == (2, NUM_CLASSES), out.shape
    assert bool(jnp.all(jnp.isfinite(out)))
    print("KERNEL_OK")
</pallas_src>

<mosaic_0001>
module attributes {stable_mosaic.version = 11 : i64} {
  func.func @vit_fused_kernel(%arg0: i32, %arg1: memref<40x64xbf16, #tpu.memory_space<vmem>>, %arg2: memref<64x32xbf16, #tpu.memory_space<vmem>>, %arg3: memref<43x32xf32, #tpu.memory_space<vmem>>, %arg4: memref<4x128xf32, #tpu.memory_space<vmem>>, %arg5: memref<3x32x128xbf16, #tpu.memory_space<vmem>>, %arg6: memref<3x128x32xbf16, #tpu.memory_space<vmem>>, %arg7: memref<32x128xbf16, #tpu.memory_space<vmem>>, %arg8: memref<8x128xf32, #tpu.memory_space<vmem>>) attributes {dimension_semantics = [#tpu.dimension_semantics<arbitrary>], iteration_bounds = array<i64: 1>, scalar_prefetch = 0 : i64, scratch_operands = 0 : i64, tpu.core_type = #tpu.core_type<tc>, window_params = [{pipeline_mode = #tpu.pipeline_mode<synchronous>, transform_indices = @transform_0, window_bounds = array<i64: 40, 64>}, {pipeline_mode = #tpu.pipeline_mode<synchronous>, transform_indices = @transform_1, window_bounds = array<i64: 64, 32>}, {pipeline_mode = #tpu.pipeline_mode<synchronous>, transform_indices = @transform_2, window_bounds = array<i64: 43, 32>}, {pipeline_mode = #tpu.pipeline_mode<synchronous>, transform_indices = @transform_3, window_bounds = array<i64: 4, 128>}, {pipeline_mode = #tpu.pipeline_mode<synchronous>, transform_indices = @transform_4, window_bounds = array<i64: 3, 32, 128>}, {pipeline_mode = #tpu.pipeline_mode<synchronous>, transform_indices = @transform_5, window_bounds = array<i64: 3, 128, 32>}, {pipeline_mode = #tpu.pipeline_mode<synchronous>, transform_indices = @transform_6, window_bounds = array<i64: 32, 128>}, {pipeline_mode = #tpu.pipeline_mode<synchronous>, transform_indices = @transform_7, window_bounds = array<i64: 8, 128>}]} {
    %c0 = arith.constant 0 : index
    %c0_0 = arith.constant 0 : index
    %0 = vector.load %arg1[%c0, %c0_0] : memref<40x64xbf16, #tpu.memory_space<vmem>>, vector<40x64xbf16>
    %c0_1 = arith.constant 0 : index
    %c0_2 = arith.constant 0 : index
    %1 = vector.load %arg2[%c0_1, %c0_2] : memref<64x32xbf16, #tpu.memory_space<vmem>>, vector<64x32xbf16>
    %cst = arith.constant dense<0.000000e+00> : vector<40x32xf32>
    %2 = tpu.matmul %0, %1, %cst {dimension_numbers = #tpu.dot_dimension_numbers<[1], [0], [0], [1], [0, 0, 1, 1], [], []>} : vector<40x64xbf16>, vector<64x32xbf16>, vector<40x32xf32> -> vector<40x32xf32>
    %c0_3 = arith.constant 0 : index
    %c0_4 = arith.constant 0 : index
    %3 = vector.load %arg3[%c0_3, %c0_4] : memref<43x32xf32, #tpu.memory_space<vmem>>, vector<40x32xf32>
    %4 = arith.addf %2, %3 : vector<40x32xf32>
    %cst_5 = arith.constant dense<0.000000e+00> : vector<40xf32>
    %5 = vector.multi_reduction <add>, %4, %cst_5 [1] : vector<40x32xf32> to vector<40xf32>
    %6 = vector.shape_cast %5 : vector<40xf32> to vector<40x1xf32>
    %cst_6 = arith.constant 3.200000e+01 : f32
    %7 = vector.broadcast %cst_6 : f32 to vector<40x1xf32>
    %8 = arith.divf %6, %7 : vector<40x1xf32>
    %9 = vector.broadcast %8 : vector<40x1xf32> to vector<40x32xf32>
    %10 = arith.subf %4, %9 : vector<40x32xf32>
    %11 = arith.mulf %10, %10 : vector<40x32xf32>
    %cst_7 = arith.constant dense<0.000000e+00> : vector<40xf32>
    %12 = vector.multi_reduction <add>, %11, %cst_7 [1] : vector<40x32xf32> to vector<40xf32>
    %13 = vector.shape_cast %12 : vector<40xf32> to vector<40x1xf32>
    %cst_8 = arith.constant 3.200000e+01 : f32
    %14 = vector.broadcast %cst_8 : f32 to vector<40x1xf32>
    %15 = arith.divf %13, %14 : vector<40x1xf32>
    %cst_9 = arith.constant 9.99999974E-6 : f32
    %16 = vector.broadcast %cst_9 : f32 to vector<40x1xf32>
    %17 = arith.addf %15, %16 : vector<40x1xf32>
    %18 = math.rsqrt %17 : vector<40x1xf32>
    %19 = vector.broadcast %18 : vector<40x1xf32> to vector<40x32xf32>
    %20 = arith.mulf %10, %19 : vector<40x32xf32>
    %21 = arith.truncf %20 : vector<40x32xf32> to vector<40x32xbf16>
    %c0_10 = arith.constant 0 : index
    %c0_11 = arith.constant 0 : index
    %c0_12 = arith.constant 0 : index
    %22 = vector.load %arg5[%c0_10, %c0_11, %c0_12] : memref<3x32x128xbf16, #tpu.memory_space<vmem>>, vector<1x32x128xbf16>
    %23 = vector.shape_cast %22 : vector<1x32x128xbf16> to vector<32x128xbf16>
    %cst_13 = arith.constant dense<0.000000e+00> : vector<40x128xf32>
    %24 = tpu.matmul %21, %23, %cst_13 {dimension_numbers = #tpu.dot_dimension_numbers<[1], [0], [0], [1], [0, 0, 1, 1], [], []>} : vector<40x32xbf16>, vector<32x128xbf16>, vector<40x128xf32> -> vector<40x128xf32>
    %c0_14 = arith.constant 0 : index
    %c0_15 = arith.constant 0 : index
    %25 = vector.load %arg4[%c0_14, %c0_15] : memref<4x128xf32, #tpu.memory_space<vmem>>, vector<1x128xf32>
    %26 = vector.broadcast %25 : vector<1x128xf32> to vector<40x128xf32>
    %27 = arith.addf %24, %26 : vector<40x128xf32>
    %cst_16 = arith.constant 5.000000e-01 : f32
    %28 = vector.broadcast %cst_16 : f32 to vector<40x128xf32>
    %29 = arith.mulf %28, %27 : vector<40x128xf32>
    %cst_17 = arith.constant 0.707106769 : f32
    %30 = vector.broadcast %cst_17 : f32 to vector<40x128xf32>
    %31 = arith.mulf %27, %30 : vector<40x128xf32>
    %32 = math.erf %31 : vector<40x128xf32>
    %cst_18 = arith.constant 1.000000e+00 : f32
    %33 = vector.broadcast %cst_18 : f32 to vector<40x128xf32>
    %34 = arith.addf %33, %32 : vector<40x128xf32>
    %35 = arith.mulf %29, %34 : vector<40x128xf32>
    %36 = arith.truncf %35 : vector<40x128xf32> to vector<40x128xbf16>
    %c0_19 = arith.constant 0 : index
    %c0_20 = arith.constant 0 : index
    %c0_21 = arith.constant 0 : index
    %37 = vector.load %arg6[%c0_19, %c0_20, %c0_21] : memref<3x128x32xbf16, #tpu.memory_space<vmem>>, vector<1x128x32xbf16>
    %38 = vector.shape_cast %37 : vector<1x128x32xbf16> to vector<128x32xbf16>
    %cst_22 = arith.constant dense<0.000000e+00> : vector<40x32xf32>
    %39 = tpu.matmul %36, %38, %cst_22 {dimension_numbers = #tpu.dot_dimension_numbers<[1], [0], [0], [1], [0, 0, 1, 1], [], []>} : vector<40x128xbf16>, vector<128x32xbf16>, vector<40x32xf32> -> vector<40x32xf32>
    %c40 = arith.constant 40 : index
    %c0_23 = arith.constant 0 : index
    %40 = vector.load %arg3[%c40, %c0_23] : memref<43x32xf32, #tpu.memory_space<vmem>>, vector<1x32xf32>
    %41 = vector.broadcast %40 : vector<1x32xf32> to vector<40x32xf32>
    %42 = arith.addf %39, %41 : vector<40x32xf32>
    %cst_24 = arith.constant dense<0.000000e+00> : vector<40xf32>
    %43 = vector.multi_reduction <add>, %42, %cst_24 [1] : vector<40x32xf32> to vector<40xf32>
    %44 = vector.shape_cast %43 : vector<40xf32> to vector<40x1xf32>
    %cst_25 = arith.constant 3.200000e+01 : f32
    %45 = vector.broadcast %cst_25 : f32 to vector<40x1xf32>
    %46 = arith.divf %44, %45 : vector<40x1xf32>
    %47 = vector.broadcast %46 : vector<40x1xf32> to vector<40x32xf32>
    %48 = arith.subf %42, %47 : vector<40x32xf32>
    %49 = arith.mulf %48, %48 : vector<40x32xf32>
    %cst_26 = arith.constant dense<0.000000e+00> : vector<40xf32>
    %50 = vector.multi_reduction <add>, %49, %cst_26 [1] : vector<40x32xf32> to vector<40xf32>
    %51 = vector.shape_cast %50 : vector<40xf32> to vector<40x1xf32>
    %cst_27 = arith.constant 3.200000e+01 : f32
    %52 = vector.broadcast %cst_27 : f32 to vector<40x1xf32>
    %53 = arith.divf %51, %52 : vector<40x1xf32>
    %cst_28 = arith.constant 9.99999974E-6 : f32
    %54 = vector.broadcast %cst_28 : f32 to vector<40x1xf32>
    %55 = arith.addf %53, %54 : vector<40x1xf32>
    %56 = math.rsqrt %55 : vector<40x1xf32>
    %57 = vector.broadcast %56 : vector<40x1xf32> to vector<40x32xf32>
    %58 = arith.mulf %48, %57 : vector<40x32xf32>
    %59 = arith.truncf %58 : vector<40x32xf32> to vector<40x32xbf16>
    %c1 = arith.constant 1 : index
    %c0_29 = arith.constant 0 : index
    %c0_30 = arith.constant 0 : index
    %60 = vector.load %arg5[%c1, %c0_29, %c0_30] : memref<3x32x128xbf16, #tpu.memory_space<vmem>>, vector<1x32x128xbf16>
    %61 = vector.shape_cast %60 : vector<1x32x128xbf16> to vector<32x128xbf16>
    %cst_31 = arith.constant dense<0.000000e+00> : vector<40x128xf32>
    %62 = tpu.matmul %59, %61, %cst_31 {dimension_numbers = #tpu.dot_dimension_numbers<[1], [0], [0], [1], [0, 0, 1, 1], [], []>} : vector<40x32xbf16>, vector<32x128xbf16>, vector<40x128xf32> -> vector<40x128xf32>
    %c1_32 = arith.constant 1 : index
    %c0_33 = arith.constant 0 : index
    %63 = vector.load %arg4[%c1_32, %c0_33] : memref<4x128xf32, #tpu.memory_space<vmem>>, vector<1x128xf32>
    %64 = vector.broadcast %63 : vector<1x128xf32> to vector<40x128xf32>
    %65 = arith.addf %62, %64 : vector<40x128xf32>
    %cst_34 = arith.constant 5.000000e-01 : f32
    %66 = vector.broadcast %cst_34 : f32 to vector<40x128xf32>
    %67 = arith.mulf %66, %65 : vector<40x128xf32>
    %cst_35 = arith.constant 0.707106769 : f32
    %68 = vector.broadcast %cst_35 : f32 to vector<40x128xf32>
    %69 = arith.mulf %65, %68 : vector<40x128xf32>
    %70 = math.erf %69 : vector<40x128xf32>
    %cst_36 = arith.constant 1.000000e+00 : f32
    %71 = vector.broadcast %cst_36 : f32 to vector<40x128xf32>
    %72 = arith.addf %71, %70 : vector<40x128xf32>
    %73 = arith.mulf %67, %72 : vector<40x128xf32>
    %74 = arith.truncf %73 : vector<40x128xf32> to vector<40x128xbf16>
    %c1_37 = arith.constant 1 : index
    %c0_38 = arith.constant 0 : index
    %c0_39 = arith.constant 0 : index
    %75 = vector.load %arg6[%c1_37, %c0_38, %c0_39] : memref<3x128x32xbf16, #tpu.memory_space<vmem>>, vector<1x128x32xbf16>
    %76 = vector.shape_cast %75 : vector<1x128x32xbf16> to vector<128x32xbf16>
    %cst_40 = arith.constant dense<0.000000e+00> : vector<40x32xf32>
    %77 = tpu.matmul %74, %76, %cst_40 {dimension_numbers = #tpu.dot_dimension_numbers<[1], [0], [0], [1], [0, 0, 1, 1], [], []>} : vector<40x128xbf16>, vector<128x32xbf16>, vector<40x32xf32> -> vector<40x32xf32>
    %c41 = arith.constant 41 : index
    %c0_41 = arith.constant 0 : index
    %78 = vector.load %arg3[%c41, %c0_41] : memref<43x32xf32, #tpu.memory_space<vmem>>, vector<1x32xf32>
    %79 = vector.broadcast %78 : vector<1x32xf32> to vector<40x32xf32>
    %80 = arith.addf %77, %79 : vector<40x32xf32>
    %cst_42 = arith.constant dense<0.000000e+00> : vector<40xf32>
    %81 = vector.multi_reduction <add>, %80, %cst_42 [1] : vector<40x32xf32> to vector<40xf32>
    %82 = vector.shape_cast %81 : vector<40xf32> to vector<40x1xf32>
    %cst_43 = arith.constant 3.200000e+01 : f32
    %83 = vector.broadcast %cst_43 : f32 to vector<40x1xf32>
    %84 = arith.divf %82, %83 : vector<40x1xf32>
    %85 = vector.broadcast %84 : vector<40x1xf32> to vector<40x32xf32>
    %86 = arith.subf %80, %85 : vector<40x32xf32>
    %87 = arith.mulf %86, %86 : vector<40x32xf32>
    %cst_44 = arith.constant dense<0.000000e+00> : vector<40xf32>
    %88 = vector.multi_reduction <add>, %87, %cst_44 [1] : vector<40x32xf32> to vector<40xf32>
    %89 = vector.shape_cast %88 : vector<40xf32> to vector<40x1xf32>
    %cst_45 = arith.constant 3.200000e+01 : f32
    %90 = vector.broadcast %cst_45 : f32 to vector<40x1xf32>
    %91 = arith.divf %89, %90 : vector<40x1xf32>
    %cst_46 = arith.constant 9.99999974E-6 : f32
    %92 = vector.broadcast %cst_46 : f32 to vector<40x1xf32>
    %93 = arith.addf %91, %92 : vector<40x1xf32>
    %94 = math.rsqrt %93 : vector<40x1xf32>
    %95 = vector.broadcast %94 : vector<40x1xf32> to vector<40x32xf32>
    %96 = arith.mulf %86, %95 : vector<40x32xf32>
    %97 = arith.truncf %96 : vector<40x32xf32> to vector<40x32xbf16>
    %c2 = arith.constant 2 : index
    %c0_47 = arith.constant 0 : index
    %c0_48 = arith.constant 0 : index
    %98 = vector.load %arg5[%c2, %c0_47, %c0_48] : memref<3x32x128xbf16, #tpu.memory_space<vmem>>, vector<1x32x128xbf16>
    %99 = vector.shape_cast %98 : vector<1x32x128xbf16> to vector<32x128xbf16>
    %cst_49 = arith.constant dense<0.000000e+00> : vector<40x128xf32>
    %100 = tpu.matmul %97, %99, %cst_49 {dimension_numbers = #tpu.dot_dimension_numbers<[1], [0], [0], [1], [0, 0, 1, 1], [], []>} : vector<40x32xbf16>, vector<32x128xbf16>, vector<40x128xf32> -> vector<40x128xf32>
    %c2_50 = arith.constant 2 : index
    %c0_51 = arith.constant 0 : index
    %101 = vector.load %arg4[%c2_50, %c0_51] : memref<4x128xf32, #tpu.memory_space<vmem>>, vector<1x128xf32>
    %102 = vector.broadcast %101 : vector<1x128xf32> to vector<40x128xf32>
    %103 = arith.addf %100, %102 : vector<40x128xf32>
    %cst_52 = arith.constant 5.000000e-01 : f32
    %104 = vector.broadcast %cst_52 : f32 to vector<40x128xf32>
    %105 = arith.mulf %104, %103 : vector<40x128xf32>
    %cst_53 = arith.constant 0.707106769 : f32
    %106 = vector.broadcast %cst_53 : f32 to vector<40x128xf32>
    %107 = arith.mulf %103, %106 : vector<40x128xf32>
    %108 = math.erf %107 : vector<40x128xf32>
    %cst_54 = arith.constant 1.000000e+00 : f32
    %109 = vector.broadcast %cst_54 : f32 to vector<40x128xf32>
    %110 = arith.addf %109, %108 : vector<40x128xf32>
    %111 = arith.mulf %105, %110 : vector<40x128xf32>
    %112 = arith.truncf %111 : vector<40x128xf32> to vector<40x128xbf16>
    %c2_55 = arith.constant 2 : index
    %c0_56 = arith.constant 0 : index
    %c0_57 = arith.constant 0 : index
    %113 = vector.load %arg6[%c2_55, %c0_56, %c0_57] : memref<3x128x32xbf16, #tpu.memory_space<vmem>>, vector<1x128x32xbf16>
    %114 = vector.shape_cast %113 : vector<1x128x32xbf16> to vector<128x32xbf16>
    %cst_58 = arith.constant dense<0.000000e+00> : vector<40x32xf32>
    %115 = tpu.matmul %112, %114, %cst_58 {dimension_numbers = #tpu.dot_dimension_numbers<[1], [0], [0], [1], [0, 0, 1, 1], [], []>} : vector<40x128xbf16>, vector<128x32xbf16>, vector<40x32xf32> -> vector<40x32xf32>
    %c42 = arith.constant 42 : index
    %c0_59 = arith.constant 0 : index
    %116 = vector.load %arg3[%c42, %c0_59] : memref<43x32xf32, #tpu.memory_space<vmem>>, vector<1x32xf32>
    %117 = vector.broadcast %116 : vector<1x32xf32> to vector<40x32xf32>
    %118 = arith.addf %115, %117 : vector<40x32xf32>
    %119 = vector.extract_strided_slice %118 {offsets = [0, 0], sizes = [8, 32], strides = [1, 1]} : vector<40x32xf32> to vector<8x32xf32>
    %cst_60 = arith.constant dense<0.000000e+00> : vector<8xf32>
    %120 = vector.multi_reduction <add>, %119, %cst_60 [1] : vector<8x32xf32> to vector<8xf32>
    %121 = vector.shape_cast %120 : vector<8xf32> to vector<8x1xf32>
    %cst_61 = arith.constant 3.200000e+01 : f32
    %122 = vector.broadcast %cst_61 : f32 to vector<8x1xf32>
    %123 = arith.divf %121, %122 : vector<8x1xf32>
    %124 = vector.broadcast %123 : vector<8x1xf32> to vector<8x32xf32>
    %125 = arith.subf %119, %124 : vector<8x32xf32>
    %126 = arith.mulf %125, %125 : vector<8x32xf32>
    %cst_62 = arith.constant dense<0.000000e+00> : vector<8xf32>
    %127 = vector.multi_reduction <add>, %126, %cst_62 [1] : vector<8x32xf32> to vector<8xf32>
    %128 = vector.shape_cast %127 : vector<8xf32> to vector<8x1xf32>
    %cst_63 = arith.constant 3.200000e+01 : f32
    %129 = vector.broadcast %cst_63 : f32 to vector<8x1xf32>
    %130 = arith.divf %128, %129 : vector<8x1xf32>
    %cst_64 = arith.constant 9.99999974E-6 : f32
    %131 = vector.broadcast %cst_64 : f32 to vector<8x1xf32>
    %132 = arith.addf %130, %131 : vector<8x1xf32>
    %133 = math.rsqrt %132 : vector<8x1xf32>
    %134 = vector.broadcast %133 : vector<8x1xf32> to vector<8x32xf32>
    %135 = arith.mulf %125, %134 : vector<8x32xf32>
    %136 = arith.truncf %135 : vector<8x32xf32> to vector<8x32xbf16>
    %c0_65 = arith.constant 0 : index
    %c0_66 = arith.constant 0 : index
    %137 = vector.load %arg7[%c0_65, %c0_66] : memref<32x128xbf16, #tpu.memory_space<vmem>>, vector<32x128xbf16>
    %cst_67 = arith.constant dense<0.000000e+00> : vector<8x128xf32>
    %138 = tpu.matmul %136, %137, %cst_67 {dimension_numbers = #tpu.dot_dimension_numbers<[1], [0], [0], [1], [0, 0, 1, 1], [], []>} : vector<8x32xbf16>, vector<32x128xbf16>, vector<8x128xf32> -> vector<8x128xf32>
    %c3 = arith.constant 3 : index
    %c0_68 = arith.constant 0 : index
    %139 = vector.load %arg4[%c3, %c0_68] : memref<4x128xf32, #tpu.memory_space<vmem>>, vector<1x128xf32>
    %140 = vector.broadcast %139 : vector<1x128xf32> to vector<8x128xf32>
    %141 = arith.addf %138, %140 : vector<8x128xf32>
    %c0_69 = arith.constant 0 : index
    %c0_70 = arith.constant 0 : index
    %142 = vector.load %arg8[%c0_69, %c0_70] : memref<8x128xf32, #tpu.memory_space<vmem>>, vector<8x128xf32>
    tpu.vector_store %arg8[%c0_69, %c0_70], %141 {strides = array<i32>} : memref<8x128xf32, #tpu.memory_space<vmem>>, vector<8x128xf32>,
    return
  }
  func.func @transform_0(%arg0: i32) -> (i32, i32) {
    %c0_i32 = arith.constant 0 : i32
    %c0_i32_0 = arith.constant 0 : i32
    %c0_i32_1 = arith.constant 0 : i32
    return %c0_i32, %c0_i32_0 : i32, i32
  }
  func.func @transform_1(%arg0: i32) -> (i32, i32) {
    %c0_i32 = arith.constant 0 : i32
    %c0_i32_0 = arith.constant 0 : i32
    %c0_i32_1 = arith.constant 0 : i32
    return %c0_i32, %c0_i32_0 : i32, i32
  }
  func.func @transform_2(%arg0: i32) -> (i32, i32) {
    %c0_i32 = arith.constant 0 : i32
    %c0_i32_0 = arith.constant 0 : i32
    %c0_i32_1 = arith.constant 0 : i32
    return %c0_i32, %c0_i32_0 : i32, i32
  }
  func.func @transform_3(%arg0: i32) -> (i32, i32) {
    %c0_i32 = arith.constant 0 : i32
    %c0_i32_0 = arith.constant 0 : i32
    %c0_i32_1 = arith.constant 0 : i32
    return %c0_i32, %c0_i32_0 : i32, i32
  }
  func.func @transform_4(%arg0: i32) -> (i32, i32, i32) {
    %c0_i32 = arith.constant 0 : i32
    %c0_i32_0 = arith.constant 0 : i32
    %c0_i32_1 = arith.constant 0 : i32
    %c0_i32_2 = arith.constant 0 : i32
    return %c0_i32, %c0_i32_0, %c0_i32_1 : i32, i32, i32
  }
  func.func @transform_5(%arg0: i32) -> (i32, i32, i32) {
    %c0_i32 = arith.constant 0 : i32
    %c0_i32_0 = arith.constant 0 : i32
    %c0_i32_1 = arith.constant 0 : i32
    %c0_i32_2 = arith.constant 0 : i32
    return %c0_i32, %c0_i32_0, %c0_i32_1 : i32, i32, i32
  }
  func.func @transform_6(%arg0: i32) -> (i32, i32) {
    %c0_i32 = arith.constant 0 : i32
    %c0_i32_0 = arith.constant 0 : i32
    %c0_i32_1 = arith.constant 0 : i32
    return %c0_i32, %c0_i32_0 : i32, i32
  }
  func.func @transform_7(%arg0: i32) -> (i32, i32) {
    %c0_i32 = arith.constant 0 : i32
    %c0_i32_0 = arith.constant 0 : i32
    %c0_i32_1 = arith.constant 0 : i32
    return %c0_i32, %c0_i32_0 : i32, i32
  }
}

</mosaic_0001>

<bundles_post_ra>
// kernel: vit_forward.1
= control target key start
LH: loop header
LB: loop body
LE: loop exit
PB: predicated region body
PF: predicated region fallthrough
CT: control target
= control target key end

     0   :  { %v1574_v0 = vmov 0.0   ;;  %vm1575_vm0 = vmmov 0   ;;  %vm82_vm1 = vcmask 523264   ;;  %vm148_vm2 = vcmask 261120   ;;  %s1904_s1 = inlined_call_operand.vmem [shape: bf16[64,32], index: 1, kind: input, shape index: {}]   ;;  %s1905_s0 = inlined_call_operand.vmem [shape: bf16[40,64], index: 0, kind: input, shape index: {}]   ;;  %s1906_s2 = inlined_call_operand.vmem [shape: f32[43,32], index: 2, kind: input, shape index: {}]   ;;  %s1907_s4 = inlined_call_operand.vmem [shape: bf16[3,32,128], index: 4, kind: input, shape index: {}]   ;;  %s1908_s5 = inlined_call_operand.vmem [shape: bf16[3,128,32], index: 5, kind: input, shape index: {}]   ;;  %s1909_s3 = inlined_call_operand.vmem [shape: f32[4,128], index: 3, kind: input, shape index: {}]   ;;  %s1910_s6 = inlined_call_operand.vmem [shape: bf16[32,128], index: 6, kind: input, shape index: {}]   ;;  %s1911_s7 = inlined_call_operand.vmem [shape: f32[8,128], index: 7, kind: output, shape index: {}]  }
   0x1   :  { %1311 = vmatprep.subr.bf16.mxu0 %v1574_v0  ;;  %v1473_v1 = vld [vmem:[%s1904_s1 + $0x18] sm:$0xff]   ;;  %1319 = vmatprep.mubr.msk.bf16.mxu0 %vm1575_vm0, %v1574_v0  ;;  %v1474_v2 = vld [vmem:[%s1904_s1 + $0x10] sm:$0xff]   ;;  %v1475_v3 = vld [vmem:[%s1904_s1 + $0x8] sm:$0xff]  }
   0x2   :  { %1331 = vmatprep.subr.bf16.mxu1 %v1574_v0  ;;  %1335 = vmatprep.mubr.msk.bf16.mxu1 %vm1575_vm0, %v1574_v0  ;;  %v1476_v4 = vld [vmem:[%s1904_s1] sm:$0xff]   ;;  %v1478_v6 = vld [vmem:[%s1905_s0 + $0x8] sm:$0xff]   ;;  %v1479_v7 = vld [vmem:[%s1905_s0 + $0x10] ss:$0 sps:$4 sm:$0xff]  }
   0x3   :  { %1312 = vmatpush3.bf16.msra.mxu0 %v1473_v1  ;;  %v1477_v5 = vld [vmem:[%s1905_s0] sm:$0xff]   ;;  %v41_v12 = vld [vmem:[%s1906_s2 + $0x8] sm:$0xff]  ;;  %v42_v17 = vld [vmem:[%s1906_s2 + $0x10] sm:$0xff] }
   0x4   :  { %1313 = vmatprep.subr.bf16.mxu0 %v1574_v0  ;;  %v40_v8 = vld [vmem:[%s1906_s2] sm:$0xff]  ;;  %v43_v38 = vld [vmem:[%s1906_s2 + $0x18] sm:$0xff]  ;;  %v1480_v55 = vld [vmem:[%s1907_s4 + $0x8] sm:$0xff]  }
   0x5   :  { %v44_v25 = vld [vmem:[%s1906_s2 + $0x20] sm:$0xff]  ;;  %1332 = vmatpush3.bf16.msra.mxu1 %v1480_v55 }
   0x6   :  { %1333 = vmatprep.subr.bf16.mxu1 %v1574_v0  ;;  %v1481_v56 = vld [vmem:[%s1907_s4] sm:$0xff]  }
   0x7   :  { %1314 = vmatpush3.bf16.msra.mxu0 %v1474_v2 }
   0x8   :  { %1315 = vmatprep.subr.bf16.mxu0 %v1574_v0 }
   0x9   :  { %1334 = vmatpush3.bf16.msra.mxu1 %v1481_v56 }
   0xa   :  { %1347 = vmatprep.subr.bf16.mxu1 %v1574_v0 }
   0xb   :  { %1316 = vmatpush3.bf16.msra.mxu0 %v1475_v3 }
   0xc   :  { %1317 = vmatprep.subr.bf16.mxu0 %v1574_v0 }
   0xf   :  { %1318 = vmatpush3.bf16.msra.mxu0 %v1476_v4 }
  0x10   :  { %1375 = vmatprep.subr.bf16.mxu0 %v1574_v0 }
  0x12   :  { %1320 = vmatmul.mubr.msk.bf16.vlgmr.msra.gmra.mxu0 %vm82_vm1, %v1477_v5 }
  0x13   :  { %1323 = vmatprep.mubr.msk.bf16.mxu0 %vm1575_vm0, %v1574_v0 }
  0x1a   :  { %1324 = vmatmul.mubr.msk.bf16.gmra.mxu0 %vm82_vm1, %v1478_v6 }
  0x1b   :  { %1327 = vmatprep.mubr.msk.bf16.mxu0 %vm1575_vm0, %v1574_v0 }
  0x22   :  { %1328 = vmatmul.mubr.msk.bf16.gmra.mxu0 %vm82_vm1, %v1479_v7 }
  0x23   :  { %1379 = vmatprep.mubr.msk.bf16.mxu0 %vm1575_vm0, %v1574_v0 }
  0xd2   :  { %v126_v9 = vpop.f32.mrf.mxu0 }
  0xd3   :  { %v127_v10 = vadd.f32 %v126_v9, %v40_v8 }
  0xd4   :  { %v1321_v11 = vpop.f32.mrf.mxu0 }
  0xd5   :  { %v149_v13 = vsel %vm148_vm2, %v127_v10, 0.0  ;;  %v1483_v11 = vld [vmem:[%s1908_s5 + $0x30] sm:$0xff]  }
  0xd6   :  { %150 = vadd.xlane.f32.xlu0 %v149_v13  ;;  %v129_v14 = vpop.f32.mrf.mxu0  ;;  %v1485_v13 = vld [vmem:[%s1908_s5 + $0x20] sm:$0xff]  }
  0xd7   :  { %v130_v15 = vadd.f32 %v129_v14, %v41_v12  ;;  %v1484_v12 = vld [vmem:[%s1908_s5 + $0x28] sm:$0xff]   ;;  %v1486_v14 = vld [vmem:[%s1908_s5 + $0x18] sm:$0xff]  }
  0xd8   :  { %v1322_v16 = vpop.f32.mrf.mxu0 }
  0xd9   :  { %v152_v18 = vsel %vm148_vm2, %v130_v15, 0.0  ;;  %v1488_v16 = vld [vmem:[%s1908_s5 + $0x8] sm:$0xff]  }
  0xda   :  { %153 = vadd.xlane.f32.xlu0 %v152_v18  ;;  %v134_v19 = vpop.f32.mrf.mxu0 }
  0xdb   :  { %v135_v20 = vadd.f32 %v134_v19, %v42_v17  ;;  %v1489_v17 = vld [vmem:[%s1908_s5] sm:$0xff]  }
  0xdc   :  { %v1325_v21 = vpop.f32.mrf.mxu0 }
  0xdd   :  { %v155_v22 = vsel %vm148_vm2, %v135_v20, 0.0 }
  0xde   :  { %v137_v23 = vpop.f32.mrf.mxu0  ;;  %156 = vadd.xlane.f32.xlu0 %v155_v22 }
  0xdf   :  { %v138_v42 = vadd.f32 %v137_v23, %v43_v38 }
  0xe0   :  { %v1326_v24 = vpop.f32.mrf.mxu0 }
  0xe1   :  { %v158_v47 = vsel %vm148_vm2, %v138_v42, 0.0 }
  0xe2   :  { %v142_v26 = vpop.f32.mrf.mxu0 }
  0xe3   :  { %v143_v27 = vadd.f32 %v142_v26, %v44_v25 }
  0xe4   :  { %v1329_v28 = vpop.f32.mrf.mxu0 }
  0xe5   :  { %v161_v29 = vsel %vm148_vm2, %v143_v27, 0.0 }
  0xe6   :  { %162 = vadd.xlane.f32.xlu0 %v161_v29  ;;  %v145_v30 = vpop.f32.mrf.mxu0 }
  0xe8   :  { %v1330_v31 = vpop.f32.mrf.mxu0 }
 0x15f   :  { %v151_v32 = vpop.xlane.xlu0 %150 }
 0x160   :  { %v165_v33 = vmul.f32 0.03125, %v151_v32 }
 0x162   :  { %v170_v34 = vsub.f32 %v127_v10, %v165_v33  ;;  %v1482_v10 = vld [vmem:[%s1908_s5 + $0x38] sm:$0xff]  }
 0x163   :  { %v154_v35 = vpop.xlane.xlu0 %153 }
 0x164   :  { %v166_v36 = vmul.f32 0.03125, %v154_v35  ;;  %v175_v37 = vmul.f32 %v170_v34, %v170_v34  ;;  %v1164_v35 = vld [vmem:[%s1909_s3] ss:$0 sm:$0xff] }
 0x166   :  { %v171_v39 = vsub.f32 %v130_v15, %v166_v36  ;;  %v180_v40 = vsel %vm148_vm2, %v175_v37, 0.0  ;;  %v1487_v15 = vld [vmem:[%s1908_s5 + $0x10] sm:$0xff]  }
 0x167   :  { %181 = vadd.xlane.f32.xlu1 %v180_v40  ;;  %v157_v41 = vpop.xlane.xlu0 %156 }
 0x168   :  { %v176_v43 = vmul.f32 %v171_v39, %v171_v39  ;;  %v167_v44 = vmul.f32 0.03125, %v157_v41 }
 0x16a   :  { %v183_v45 = vsel %vm148_vm2, %v176_v43, 0.0  ;;  %v1674_v46 = vsub.f32 %v135_v20, %v167_v44 }
 0x16b   :  { %184 = vadd.xlane.f32.xlu1 %v183_v45 }
 0x16c   :  { %v177_v48 = vmul.f32 %v1674_v46, %v1674_v46 }
 0x16e   :  { %v186_v51 = vsel %vm148_vm2, %v177_v48, 0.0 }
 0x16f   :  { %159 = vadd.xlane.f32.xlu1 %v158_v47  ;;  %v163_v49 = vpop.xlane.xlu0 %162 }
 0x170   :  { %v169_v50 = vmul.f32 0.03125, %v163_v49 }
 0x172   :  { %v1680_v52 = vsub.f32 %v143_v27, %v169_v50 }
 0x173   :  { %187 = vadd.xlane.f32.xlu1 %v186_v51 }
 0x174   :  { %v179_v53 = vmul.f32 %v1680_v52, %v1680_v52 }
 0x176   :  { %v192_v54 = vsel %vm148_vm2, %v179_v53, 0.0 }
 0x177   :  { %193 = vadd.xlane.f32.xlu1 %v192_v54 }
 0x1f0   :  { %v182_v57 = vpop.xlane.xlu1 %181 }
 0x1f1   :  { %v195_v58 = vmul.f32 0.03125, %v182_v57 }
 0x1f3   :  { %v200_v59 = vadd.f32 1e-05, %v195_v58 }
 0x1f4   :  { %v185_v60 = vpop.xlane.xlu1 %184 }
 0x1f5   :  { %v196_v61 = vmul.f32 0.03125, %v185_v60  ;;  %1512 = vrsqrt.f32 %v200_v59 }
 0x1f7   :  { %v201_v62 = vadd.f32 1e-05, %v196_v61 }
 0x1f8   :  { %v160_v63 = vpop.xlane.xlu1 %159 }
 0x1f9   :  { %1514 = vrsqrt.f32 %v201_v62  ;;  %v168_v1 = vmul.f32 0.03125, %v160_v63 }
 0x1fb   :  { %v173_v2 = vsub.f32 %v138_v42, %v168_v1 }
 0x1fc   :  { %v188_v18 = vpop.xlane.xlu1 %187 }
 0x1fd   :  { %v178_v3 = vmul.f32 %v173_v2, %v173_v2  ;;  %v197_v19 = vmul.f32 0.03125, %v188_v18  ;;  %v1170_v18 = vld [vmem:[%s1906_s2 + $0x28] ss:$0 sm:$0xff] }
 0x1ff   :  { %v189_v4 = vsel %vm148_vm2, %v178_v3, 0.0  ;;  %v202_v21 = vadd.f32 1e-05, %v197_v19 }
 0x200   :  { %190 = vadd.xlane.f32.xlu0 %v189_v4  ;;  %v194_v20 = vpop.xlane.xlu1 %193 }
 0x201   :  { %v199_v23 = vmul.f32 0.03125, %v194_v20  ;;  %1516 = vrsqrt.f32 %v202_v21 }
 0x202   :  { %v1513_v5 = vpop.eup %1512 }
 0x203   :  { %v210_v7 = vmul.f32 %v1513_v5, %v170_v34  ;;  %v204_v26 = vadd.f32 1e-05, %v199_v23 }
 0x206   :  { %v1515_v6 = vpop.eup %1514 }
 0x207   :  { %v211_v8 = vmul.f32 %v1515_v6, %v171_v39 }
 0x209   :  { %v215_v9 = vpack.c.bf16 %v211_v8, %v210_v7 }
 0x20b   :  { %1336 = vmatmul.mubr.msk.bf16.vlgmr.msra.gmra.mxu1 %vm148_vm2, %v215_v9 }
 0x20c   :  { %1339 = vmatprep.mubr.msk.bf16.mxu1 %vm1575_vm0, %v1574_v0  ;;  %1348 = vmatpush3.bf16.msra.mxu1 %v1482_v10 }
 0x20d   :  { %1349 = vmatprep.subr.bf16.mxu1 %v1574_v0 }
 0x20e   :  { %v1517_v27 = vpop.eup %1516 }
 0x20f   :  { %v212_v29 = vmul.f32 %v1517_v27, %v1674_v46 }
 0x210   :  { %1350 = vmatpush3.bf16.msra.mxu1 %v1483_v11 }
 0x211   :  { %1351 = vmatprep.subr.bf16.mxu1 %v1574_v0 }
 0x214   :  { %1352 = vmatpush3.bf16.msra.mxu1 %v1484_v12 }
 0x215   :  { %1353 = vmatprep.subr.bf16.mxu1 %v1574_v0 }
 0x218   :  { %1354 = vmatpush3.bf16.msra.mxu1 %v1485_v13 }
 0x219   :  { %1355 = vmatprep.subr.bf16.mxu1 %v1574_v0 }
 0x21c   :  { %1356 = vmatpush3.bf16.msra.mxu1 %v1486_v14 }
 0x21d   :  { %1357 = vmatprep.subr.bf16.mxu1 %v1574_v0 }
 0x220   :  { %1358 = vmatpush3.bf16.msra.mxu1 %v1487_v15 }
 0x221   :  { %1359 = vmatprep.subr.bf16.mxu1 %v1574_v0 }
 0x224   :  { %1360 = vmatpush3.bf16.msra.mxu1 %v1488_v16 }
 0x225   :  { %1361 = vmatprep.subr.bf16.mxu1 %v1574_v0 }
 0x228   :  { %1362 = vmatpush3.bf16.msra.mxu1 %v1489_v17 }
 0x229   :  { %1419 = vmatprep.subr.bf16.mxu1 %v1574_v0 }
 0x289   :  { %v191_v22 = vpop.xlane.xlu0 %190 }
 0x28a   :  { %v198_v24 = vmul.f32 0.03125, %v191_v22 }
 0x28c   :  { %v203_v25 = vadd.f32 1e-05, %v198_v24 }
 0x28e   :  { %1518 = vrsqrt.f32 %v203_v25 }
 0x28f   :  { %1520 = vrsqrt.f32 %v204_v26 }
 0x29b   :  { %v1519_v28 = vpop.eup %1518 }
 0x29c   :  { %v213_v30 = vmul.f32 %v1519_v28, %v173_v2  ;;  %v1521_v32 = vpop.eup %1520 }
 0x29d   :  { %v214_v33 = vmul.f32 %v1521_v32, %v1680_v52 }
 0x29e   :  { %v216_v31 = vpack.c.bf16 %v213_v30, %v212_v29 }
 0x29f   :  { %v217_v34 = vpack.c.bf16 %v214_v33, %v214_v33 }
 0x2a0   :  { %1340 = vmatmul.mubr.msk.bf16.gmra.mxu1 %vm148_vm2, %v216_v31 }
 0x2a1   :  { %1343 = vmatprep.mubr.msk.bf16.mxu1 %vm1575_vm0, %v1574_v0 }
 0x2a8   :  { %1344 = vmatmul.mubr.msk.bf16.gmra.mxu1 %vm148_vm2, %v217_v34 }
 0x2a9   :  { %1363 = vmatprep.mubr.msk.bf16.mxu1 %vm1575_vm0, %v1574_v0 }
 0x2cb   :  { %v282_v36 = vpop.f32.mrf.mxu1 }
 0x2cc   :  { %v283_v37 = vadd.f32 %v1164_v35, %v282_v36 }
 0x2cd   :  { %v1337_v38 = vpop.f32.mrf.mxu1 }
 0x2ce   :  { %v309_v39 = vmul.f32 0.70710677, %v283_v37  ;;  %v304_v47 = vmul.f32 0.5, %v283_v37 }
 0x2cf   :  { %v285_v40 = vpop.f32.mrf.mxu1 }
 0x2d0   :  { %1522 = verf.f32 %v309_v39  ;;  %v286_v41 = vadd.f32 %v1164_v35, %v285_v40 }
 0x2d1   :  { %v1338_v42 = vpop.f32.mrf.mxu1 }
 0x2d2   :  { %v310_v43 = vmul.f32 0.70710677, %v286_v41  ;;  %v305_v48 = vmul.f32 0.5, %v286_v41 }
 0x2d4   :  { %1524 = verf.f32 %v310_v43 }
 0x2dd   :  { %v1523_v44 = vpop.eup %1522 }
 0x2de   :  { %v319_v45 = vadd.f32 1.0, %v1523_v44 }
 0x2e0   :  { %v324_v50 = vmul.f32 %v319_v45, %v304_v47 }
 0x2e1   :  { %v1525_v46 = vpop.eup %1524 }
 0x2e2   :  { %v320_v49 = vadd.f32 1.0, %v1525_v46 }
 0x2e4   :  { %v325_v51 = vmul.f32 %v320_v49, %v305_v48 }
 0x2e6   :  { %v329_v52 = vpack.c.bf16 %v325_v51, %v324_v50  ;;  %v1490_v51 = vld [vmem:[%s1907_s4 + $0x18] sm:$0xff]  }
 0x2e7   :  { %1376 = vmatpush3.bf16.msra.mxu0 %v1490_v51 }
 0x2e8   :  { %1364 = vmatmul.mubr.bf16.vlgmr.msra.gmra.mxu1 %v329_v52  ;;  %1377 = vmatprep.subr.bf16.mxu0 %v1574_v0  ;;  %v1491_v52 = vld [vmem:[%s1907_s4 + $0x10] sm:$0xff]  }
 0x2e9   :  { %1367 = vmatprep.mubr.msk.bf16.mxu1 %vm1575_vm0, %v1574_v0 }
 0x2eb   :  { %1378 = vmatpush3.bf16.msra.mxu0 %v1491_v52 }
 0x2ec   :  { %1391 = vmatprep.subr.bf16.mxu0 %v1574_v0 }
 0x360   :  { %v290_v53 = vpop.f32.mrf.mxu1 }
 0x361   :  { %v291_v54 = vadd.f32 %v1164_v35, %v290_v53 }
 0x362   :  { %v1341_v55 = vpop.f32.mrf.mxu1 }
 0x363   :  { %v311_v56 = vmul.f32 0.70710677, %v291_v54  ;;  %v306_v7 = vmul.f32 0.5, %v291_v54 }
 0x364   :  { %v293_v57 = vpop.f32.mrf.mxu1 }
 0x365   :  { %1526 = verf.f32 %v311_v56  ;;  %v294_v58 = vadd.f32 %v1164_v35, %v293_v57 }
 0x366   :  { %v1342_v59 = vpop.f32.mrf.mxu1 }
 0x367   :  { %v312_v60 = vmul.f32 0.70710677, %v294_v58  ;;  %v307_v8 = vmul.f32 0.5, %v294_v58 }
 0x368   :  { %v298_v61 = vpop.f32.mrf.mxu1 }
 0x369   :  { %1528 = verf.f32 %v312_v60  ;;  %v299_v62 = vadd.f32 %v1164_v35, %v298_v61 }
 0x36a   :  { %v1345_v63 = vpop.f32.mrf.mxu1 }
 0x36b   :  { %v313_v1 = vmul.f32 0.70710677, %v299_v62  ;;  %v308_v15 = vmul.f32 0.5, %v299_v62 }
 0x36c   :  { %v301_v2 = vpop.f32.mrf.mxu1 }
 0x36d   :  { %1530 = verf.f32 %v313_v1 }
 0x36e   :  { %v1346_v3 = vpop.f32.mrf.mxu1 }
 0x372   :  { %v1527_v4 = vpop.eup %1526 }
 0x373   :  { %v321_v5 = vadd.f32 1.0, %v1527_v4 }
 0x375   :  { %v326_v10 = vmul.f32 %v321_v5, %v306_v7 }
 0x376   :  { %v1529_v6 = vpop.eup %1528 }
 0x377   :  { %v322_v9 = vadd.f32 1.0, %v1529_v6 }
 0x379   :  { %v327_v11 = vmul.f32 %v322_v9, %v307_v8 }
 0x37a   :  { %v1531_v12 = vpop.eup %1530 }
 0x37b   :  { %v330_v13 = vpack.c.bf16 %v327_v11, %v326_v10  ;;  %v323_v14 = vadd.f32 1.0, %v1531_v12 }
 0x37d   :  { %1368 = vmatmul.mubr.bf16.gmra.mxu1 %v330_v13  ;;  %v328_v16 = vmul.f32 %v323_v14, %v308_v15 }
 0x37e   :  { %1371 = vmatprep.mubr.msk.bf16.mxu1 %vm1575_vm0, %v1574_v0 }
 0x37f   :  { %v331_v17 = vpack.c.bf16 %v328_v16, %v328_v16  ;;  %v1492_v16 = vld [vmem:[%s1908_s5 + $0x78] sm:$0xff]  }
 0x385   :  { %1372 = vmatmul.mubr.bf16.gmra.mxu1 %v331_v17  ;;  %v1493_v17 = vld [vmem:[%s1908_s5 + $0x70] sm:$0xff]  }
 0x386   :  { %1423 = vmatprep.mubr.msk.bf16.mxu1 %vm1575_vm0, %v1574_v0 }
 0x3a8   :  { %v435_v19 = vpop.f32.mrf.mxu1 }
 0x3a9   :  { %v436_v20 = vadd.f32 %v1170_v18, %v435_v19  ;;  %v1495_v19 = vld [vmem:[%s1908_s5 + $0x60] sm:$0xff]  }
 0x3aa   :  { %v1365_v21 = vpop.f32.mrf.mxu1 }
 0x3ab   :  { %v457_v22 = vsel %vm148_vm2, %v436_v20, 0.0  ;;  %v1497_v21 = vld [vmem:[%s1908_s5 + $0x50] sm:$0xff]  }
 0x3ac   :  { %458 = vadd.xlane.f32.xlu0 %v457_v22  ;;  %v438_v23 = vpop.f32.mrf.mxu1  ;;  %v1498_v22 = vld [vmem:[%s1908_s5 + $0x48] sm:$0xff]  }
 0x3ad   :  { %v439_v24 = vadd.f32 %v1170_v18, %v438_v23  ;;  %v1499_v23 = vld [vmem:[%s1908_s5 + $0x40] sm:$0xff]  }
 0x3ae   :  { %v1366_v25 = vpop.f32.mrf.mxu1 }
 0x3af   :  { %v460_v26 = vsel %vm148_vm2, %v439_v24, 0.0 }
 0x3b0   :  { %461 = vadd.xlane.f32.xlu1 %v460_v26 }
 0x435   :  { %v459_v27 = vpop.xlane.xlu0 %458 }
 0x436   :  { %v472_v28 = vmul.f32 0.03125, %v459_v27 }
 0x438   :  { %v477_v29 = vsub.f32 %v436_v20, %v472_v28  ;;  %v1496_v20 = vld [vmem:[%s1908_s5 + $0x58] sm:$0xff]  }
 0x439   :  { %v462_v30 = vpop.xlane.xlu1 %461 }
 0x43a   :  { %v473_v31 = vmul.f32 0.03125, %v462_v30  ;;  %v482_v32 = vmul.f32 %v477_v29, %v477_v29 }
 0x43c   :  { %v478_v33 = vsub.f32 %v439_v24, %v473_v31  ;;  %v487_v34 = vsel %vm148_vm2, %v482_v32, 0.0 }
 0x43d   :  { %488 = vadd.xlane.f32.xlu0 %v487_v34  ;;  %v443_v35 = vpop.f32.mrf.mxu1 }
 0x43e   :  { %v444_v36 = vadd.f32 %v1170_v18, %v443_v35  ;;  %v483_v37 = vmul.f32 %v478_v33, %v478_v33 }
 0x43f   :  { %v1369_v38 = vpop.f32.mrf.mxu1 }
 0x440   :  { %v490_v39 = vsel %vm148_vm2, %v483_v37, 0.0  ;;  %v463_v40 = vsel %vm148_vm2, %v444_v36, 0.0 }
 0x441   :  { %491 = vadd.xlane.f32.xlu1 %v490_v39  ;;  %464 = vadd.xlane.f32.xlu0 %v463_v40  ;;  %v446_v41 = vpop.f32.mrf.mxu1 }
 0x442   :  { %v447_v42 = vadd.f32 %v1170_v18, %v446_v41  ;;  %v1183_v41 = vld [vmem:[%s1909_s3 + $0x1] ss:$0 sm:$0xff] }
 0x443   :  { %v1370_v43 = vpop.f32.mrf.mxu1 }
 0x444   :  { %v466_v44 = vsel %vm148_vm2, %v447_v42, 0.0 }
 0x445   :  { %467 = vadd.xlane.f32.xlu1 %v466_v44  ;;  %v451_v45 = vpop.f32.mrf.mxu1 }
 0x446   :  { %v452_v46 = vadd.f32 %v1170_v18, %v451_v45  ;;  %v1494_v18 = vld [vmem:[%s1908_s5 + $0x68] sm:$0xff]  }
 0x447   :  { %v1373_v47 = vpop.f32.mrf.mxu1 }
 0x448   :  { %v469_v48 = vsel %vm148_vm2, %v452_v46, 0.0 }
 0x449   :  { %470 = vadd.xlane.f32.xlu0 %v469_v48  ;;  %v454_v49 = vpop.f32.mrf.mxu1 }
 0x44b   :  { %v1374_v50 = vpop.f32.mrf.mxu1 }
 0x4c6   :  { %v489_v53 = vpop.xlane.xlu0 %488 }
 0x4c7   :  { %v502_v54 = vmul.f32 0.03125, %v489_v53 }
 0x4c9   :  { %v507_v55 = vadd.f32 1e-05, %v502_v54 }
 0x4ca   :  { %v492_v56 = vpop.xlane.xlu1 %491  ;;  %v465_v57 = vpop.xlane.xlu0 %464 }
 0x4cb   :  { %v503_v58 = vmul.f32 0.03125, %v492_v56  ;;  %v474_v59 = vmul.f32 0.03125, %v465_v57  ;;  %1532 = vrsqrt.f32 %v507_v55 }
 0x4cd   :  { %v508_v60 = vadd.f32 1e-05, %v503_v58  ;;  %v479_v61 = vsub.f32 %v444_v36, %v474_v59 }
 0x4ce   :  { %v468_v62 = vpop.xlane.xlu1 %467 }
 0x4cf   :  { %1534 = vrsqrt.f32 %v508_v60  ;;  %v475_v63 = vmul.f32 0.03125, %v468_v62  ;;  %v484_v1 = vmul.f32 %v479_v61, %v479_v61 }
 0x4d1   :  { %v480_v2 = vsub.f32 %v447_v42, %v475_v63  ;;  %v493_v3 = vsel %vm148_vm2, %v484_v1, 0.0 }
 0x4d2   :  { %494 = vadd.xlane.f32.xlu1 %v493_v3  ;;  %v471_v4 = vpop.xlane.xlu0 %470 }
 0x4d3   :  { %v476_v5 = vmul.f32 0.03125, %v471_v4  ;;  %v485_v6 = vmul.f32 %v480_v2, %v480_v2 }
 0x4d5   :  { %v481_v7 = vsub.f32 %v452_v46, %v476_v5  ;;  %v496_v8 = vsel %vm148_vm2, %v485_v6, 0.0 }
 0x4d6   :  { %497 = vadd.xlane.f32.xlu0 %v496_v8 }
 0x4d7   :  { %v486_v9 = vmul.f32 %v481_v7, %v481_v7 }
 0x4d8   :  { %v1533_v11 = vpop.eup %1532 }
 0x4d9   :  { %v499_v10 = vsel %vm148_vm2, %v486_v9, 0.0  ;;  %v517_v13 = vmul.f32 %v1533_v11, %v477_v29 }
 0x4da   :  { %500 = vadd.xlane.f32.xlu1 %v499_v10 }
 0x4dc   :  { %v1535_v12 = vpop.eup %1534 }
 0x4dd   :  { %v518_v14 = vmul.f32 %v1535_v12, %v478_v33 }
 0x4df   :  { %v522_v15 = vpack.c.bf16 %v518_v14, %v517_v13 }
 0x4e1   :  { %1380 = vmatmul.mubr.msk.bf16.vlgmr.msra.gmra.mxu0 %vm148_vm2, %v522_v15 }
 0x4e2   :  { %1383 = vmatprep.mubr.msk.bf16.mxu0 %vm1575_vm0, %v1574_v0  ;;  %1392 = vmatpush3.bf16.msra.mxu0 %v1492_v16 }
 0x4e3   :  { %1393 = vmatprep.subr.bf16.mxu0 %v1574_v0 }
 0x4e6   :  { %1394 = vmatpush3.bf16.msra.mxu0 %v1493_v17 }
 0x4e7   :  { %1395 = vmatprep.subr.bf16.mxu0 %v1574_v0 }
 0x4ea   :  { %1396 = vmatpush3.bf16.msra.mxu0 %v1494_v18 }
 0x4eb   :  { %1397 = vmatprep.subr.bf16.mxu0 %v1574_v0 }
 0x4ee   :  { %1398 = vmatpush3.bf16.msra.mxu0 %v1495_v19 }
 0x4ef   :  { %1399 = vmatprep.subr.bf16.mxu0 %v1574_v0 }
 0x4f2   :  { %1400 = vmatpush3.bf16.msra.mxu0 %v1496_v20 }
 0x4f3   :  { %1401 = vmatprep.subr.bf16.mxu0 %v1574_v0 }
 0x4f6   :  { %1402 = vmatpush3.bf16.msra.mxu0 %v1497_v21 }
 0x4f7   :  { %1403 = vmatprep.subr.bf16.mxu0 %v1574_v0 }
 0x4fa   :  { %1404 = vmatpush3.bf16.msra.mxu0 %v1498_v22 }
 0x4fb   :  { %1405 = vmatprep.subr.bf16.mxu0 %v1574_v0 }
 0x4fe   :  { %1406 = vmatpush3.bf16.msra.mxu0 %v1499_v23 }
 0x4ff   :  { %1463 = vmatprep.subr.bf16.mxu0 %v1574_v0 }
 0x55b   :  { %v495_v24 = vpop.xlane.xlu1 %494 }
 0x55c   :  { %v504_v25 = vmul.f32 0.03125, %v495_v24  ;;  %v1205_v24 = vld [vmem:[%s1906_s2 + $0x29] ss:$0 sm:$0xff] }
 0x55e   :  { %v509_v26 = vadd.f32 1e-05, %v504_v25 }
 0x55f   :  { %v498_v27 = vpop.xlane.xlu0 %497 }
 0x560   :  { %v505_v28 = vmul.f32 0.03125, %v498_v27  ;;  %1536 = vrsqrt.f32 %v509_v26 }
 0x562   :  { %v510_v29 = vadd.f32 1e-05, %v505_v28 }
 0x563   :  { %v501_v30 = vpop.xlane.xlu1 %500 }
 0x564   :  { %1538 = vrsqrt.f32 %v510_v29  ;;  %v506_v31 = vmul.f32 0.03125, %v501_v30 }
 0x566   :  { %v511_v32 = vadd.f32 1e-05, %v506_v31 }
 0x568   :  { %1540 = vrsqrt.f32 %v511_v32 }
 0x56d   :  { %v1537_v33 = vpop.eup %1536 }
 0x56e   :  { %v519_v35 = vmul.f32 %v1537_v33, %v479_v61 }
 0x571   :  { %v1539_v34 = vpop.eup %1538 }
 0x572   :  { %v520_v36 = vmul.f32 %v1539_v34, %v480_v2 }
 0x574   :  { %v523_v37 = vpack.c.bf16 %v520_v36, %v519_v35 }
 0x575   :  { %v1541_v38 = vpop.eup %1540 }
 0x576   :  { %1384 = vmatmul.mubr.msk.bf16.gmra.mxu0 %vm148_vm2, %v523_v37  ;;  %v521_v39 = vmul.f32 %v1541_v38, %v481_v7 }
 0x577   :  { %1387 = vmatprep.mubr.msk.bf16.mxu0 %vm1575_vm0, %v1574_v0 }
 0x578   :  { %v524_v40 = vpack.c.bf16 %v521_v39, %v521_v39 }
 0x57e   :  { %1388 = vmatmul.mubr.msk.bf16.gmra.mxu0 %vm148_vm2, %v524_v40 }
 0x57f   :  { %1407 = vmatprep.mubr.msk.bf16.mxu0 %vm1575_vm0, %v1574_v0 }
 0x5a1   :  { %v590_v42 = vpop.f32.mrf.mxu0 }
 0x5a2   :  { %v591_v43 = vadd.f32 %v1183_v41, %v590_v42 }
 0x5a3   :  { %v1381_v44 = vpop.f32.mrf.mxu0 }
 0x5a4   :  { %v617_v45 = vmul.f32 0.70710677, %v591_v43  ;;  %v612_v53 = vmul.f32 0.5, %v591_v43 }
 0x5a5   :  { %v593_v46 = vpop.f32.mrf.mxu0 }
 0x5a6   :  { %1542 = verf.f32 %v617_v45  ;;  %v594_v47 = vadd.f32 %v1183_v41, %v593_v46 }
 0x5a7   :  { %v1382_v48 = vpop.f32.mrf.mxu0 }
 0x5a8   :  { %v618_v49 = vmul.f32 0.70710677, %v594_v47  ;;  %v613_v54 = vmul.f32 0.5, %v594_v47 }
 0x5aa   :  { %1544 = verf.f32 %v618_v49 }
 0x5b3   :  { %v1543_v50 = vpop.eup %1542 }
 0x5b4   :  { %v627_v51 = vadd.f32 1.0, %v1543_v50 }
 0x5b6   :  { %v632_v56 = vmul.f32 %v627_v51, %v612_v53 }
 0x5b7   :  { %v1545_v52 = vpop.eup %1544 }
 0x5b8   :  { %v628_v55 = vadd.f32 1.0, %v1545_v52 }
 0x5ba   :  { %v633_v57 = vmul.f32 %v628_v55, %v613_v54 }
 0x5bc   :  { %v637_v58 = vpack.c.bf16 %v633_v57, %v632_v56  ;;  %v1500_v57 = vld [vmem:[%s1907_s4 + $0x28] sm:$0xff]  }
 0x5bd   :  { %1420 = vmatpush3.bf16.msra.mxu1 %v1500_v57 }
 0x5be   :  { %1408 = vmatmul.mubr.bf16.vlgmr.msra.gmra.mxu0 %v637_v58  ;;  %1421 = vmatprep.subr.bf16.mxu1 %v1574_v0  ;;  %v1501_v58 = vld [vmem:[%s1907_s4 + $0x20] sm:$0xff]  }
 0x5bf   :  { %1411 = vmatprep.mubr.msk.bf16.mxu0 %vm1575_vm0, %v1574_v0 }
 0x5c1   :  { %1422 = vmatpush3.bf16.msra.mxu1 %v1501_v58 }
 0x5c2   :  { %1435 = vmatprep.subr.bf16.mxu1 %v1574_v0 }
 0x636   :  { %v598_v59 = vpop.f32.mrf.mxu0 }
 0x637   :  { %v599_v60 = vadd.f32 %v1183_v41, %v598_v59 }
 0x638   :  { %v1385_v61 = vpop.f32.mrf.mxu0 }
 0x639   :  { %v619_v62 = vmul.f32 0.70710677, %v599_v60  ;;  %v614_v13 = vmul.f32 0.5, %v599_v60 }
 0x63a   :  { %v601_v63 = vpop.f32.mrf.mxu0 }
 0x63b   :  { %1546 = verf.f32 %v619_v62  ;;  %v602_v1 = vadd.f32 %v1183_v41, %v601_v63 }
 0x63c   :  { %v1386_v2 = vpop.f32.mrf.mxu0 }
 0x63d   :  { %v620_v3 = vmul.f32 0.70710677, %v602_v1  ;;  %v615_v14 = vmul.f32 0.5, %v602_v1 }
 0x63e   :  { %v606_v4 = vpop.f32.mrf.mxu0 }
 0x63f   :  { %1548 = verf.f32 %v620_v3  ;;  %v607_v5 = vadd.f32 %v1183_v41, %v606_v4 }
 0x640   :  { %v1389_v6 = vpop.f32.mrf.mxu0 }
 0x641   :  { %v621_v7 = vmul.f32 0.70710677, %v607_v5  ;;  %v616_v21 = vmul.f32 0.5, %v607_v5 }
 0x642   :  { %v609_v8 = vpop.f32.mrf.mxu0 }
 0x643   :  { %1550 = verf.f32 %v621_v7 }
 0x644   :  { %v1390_v9 = vpop.f32.mrf.mxu0 }
 0x648   :  { %v1547_v10 = vpop.eup %1546 }
 0x649   :  { %v629_v11 = vadd.f32 1.0, %v1547_v10 }
 0x64b   :  { %v634_v16 = vmul.f32 %v629_v11, %v614_v13 }
 0x64c   :  { %v1549_v12 = vpop.eup %1548 }
 0x64d   :  { %v630_v15 = vadd.f32 1.0, %v1549_v12 }
 0x64f   :  { %v635_v17 = vmul.f32 %v630_v15, %v615_v14 }
 0x650   :  { %v1551_v18 = vpop.eup %1550 }
 0x651   :  { %v638_v19 = vpack.c.bf16 %v635_v17, %v634_v16  ;;  %v631_v20 = vadd.f32 1.0, %v1551_v18 }
 0x653   :  { %1412 = vmatmul.mubr.bf16.gmra.mxu0 %v638_v19  ;;  %v636_v22 = vmul.f32 %v631_v20, %v616_v21 }
 0x654   :  { %1415 = vmatprep.mubr.msk.bf16.mxu0 %vm1575_vm0, %v1574_v0 }
 0x655   :  { %v639_v23 = vpack.c.bf16 %v636_v22, %v636_v22  ;;  %v1502_v22 = vld [vmem:[%s1908_s5 + $0xb8] sm:$0xff]  }
 0x65b   :  { %1416 = vmatmul.mubr.bf16.gmra.mxu0 %v639_v23  ;;  %v1503_v23 = vld [vmem:[%s1908_s5 + $0xb0] sm:$0xff]  }
 0x65c   :  { %1467 = vmatprep.mubr.msk.bf16.mxu0 %vm1575_vm0, %v1574_v0 }
 0x67e   :  { %v744_v25 = vpop.f32.mrf.mxu0 }
 0x67f   :  { %v745_v26 = vadd.f32 %v1205_v24, %v744_v25  ;;  %v1505_v25 = vld [vmem:[%s1908_s5 + $0xa0] sm:$0xff]  }
 0x680   :  { %v1409_v27 = vpop.f32.mrf.mxu0 }
 0x681   :  { %v766_v28 = vsel %vm148_vm2, %v745_v26, 0.0  ;;  %v1507_v27 = vld [vmem:[%s1908_s5 + $0x90] sm:$0xff]  }
 0x682   :  { %767 = vadd.xlane.f32.xlu0 %v766_v28  ;;  %v747_v29 = vpop.f32.mrf.mxu0  ;;  %v1508_v28 = vld [vmem:[%s1908_s5 + $0x88] sm:$0xff]  }
 0x683   :  { %v748_v30 = vadd.f32 %v1205_v24, %v747_v29  ;;  %v1509_v29 = vld [vmem:[%s1908_s5 + $0x80] sm:$0xff]  }
 0x684   :  { %v1410_v31 = vpop.f32.mrf.mxu0 }
 0x685   :  { %v769_v32 = vsel %vm148_vm2, %v748_v30, 0.0 }
 0x686   :  { %770 = vadd.xlane.f32.xlu1 %v769_v32 }
 0x70b   :  { %v768_v33 = vpop.xlane.xlu0 %767 }
 0x70c   :  { %v781_v34 = vmul.f32 0.03125, %v768_v33 }
 0x70e   :  { %v786_v35 = vsub.f32 %v745_v26, %v781_v34  ;;  %v1506_v26 = vld [vmem:[%s1908_s5 + $0x98] sm:$0xff]  }
 0x70f   :  { %v771_v36 = vpop.xlane.xlu1 %770 }
 0x710   :  { %v782_v37 = vmul.f32 0.03125, %v771_v36  ;;  %v791_v38 = vmul.f32 %v786_v35, %v786_v35 }
 0x712   :  { %v787_v39 = vsub.f32 %v748_v30, %v782_v37  ;;  %v796_v40 = vsel %vm148_vm2, %v791_v38, 0.0 }
 0x713   :  { %797 = vadd.xlane.f32.xlu0 %v796_v40  ;;  %v752_v41 = vpop.f32.mrf.mxu0 }
 0x714   :  { %v753_v42 = vadd.f32 %v1205_v24, %v752_v41  ;;  %v792_v43 = vmul.f32 %v787_v39, %v787_v39 }
 0x715   :  { %v1413_v44 = vpop.f32.mrf.mxu0 }
 0x716   :  { %v799_v45 = vsel %vm148_vm2, %v792_v43, 0.0  ;;  %v772_v46 = vsel %vm148_vm2, %v753_v42, 0.0 }
 0x717   :  { %800 = vadd.xlane.f32.xlu1 %v799_v45  ;;  %773 = vadd.xlane.f32.xlu0 %v772_v46  ;;  %v755_v47 = vpop.f32.mrf.mxu0 }
 0x718   :  { %v756_v48 = vadd.f32 %v1205_v24, %v755_v47  ;;  %v1218_v47 = vld [vmem:[%s1909_s3 + $0x2] ss:$0 sm:$0xff] }
 0x719   :  { %v1414_v49 = vpop.f32.mrf.mxu0 }
 0x71a   :  { %v775_v50 = vsel %vm148_vm2, %v756_v48, 0.0 }
 0x71b   :  { %776 = vadd.xlane.f32.xlu1 %v775_v50  ;;  %v760_v51 = vpop.f32.mrf.mxu0 }
 0x71c   :  { %v761_v52 = vadd.f32 %v1205_v24, %v760_v51  ;;  %v1504_v24 = vld [vmem:[%s1908_s5 + $0xa8] sm:$0xff]  }
 0x71d   :  { %v1417_v53 = vpop.f32.mrf.mxu0 }
 0x71e   :  { %v778_v54 = vsel %vm148_vm2, %v761_v52, 0.0 }
 0x71f   :  { %779 = vadd.xlane.f32.xlu0 %v778_v54  ;;  %v763_v55 = vpop.f32.mrf.mxu0 }
 0x721   :  { %v1418_v56 = vpop.f32.mrf.mxu0 }
 0x79c   :  { %v798_v59 = vpop.xlane.xlu0 %797 }
 0x79d   :  { %v811_v60 = vmul.f32 0.03125, %v798_v59 }
 0x79f   :  { %v816_v61 = vadd.f32 1e-05, %v811_v60 }
 0x7a0   :  { %v801_v62 = vpop.xlane.xlu1 %800  ;;  %v774_v63 = vpop.xlane.xlu0 %773 }
 0x7a1   :  { %v812_v1 = vmul.f32 0.03125, %v801_v62  ;;  %v783_v2 = vmul.f32 0.03125, %v774_v63  ;;  %1552 = vrsqrt.f32 %v816_v61 }
 0x7a3   :  { %v817_v3 = vadd.f32 1e-05, %v812_v1  ;;  %v788_v4 = vsub.f32 %v753_v42, %v783_v2 }
 0x7a4   :  { %v777_v5 = vpop.xlane.xlu1 %776 }
 0x7a5   :  { %1554 = vrsqrt.f32 %v817_v3  ;;  %v784_v6 = vmul.f32 0.03125, %v777_v5  ;;  %v793_v7 = vmul.f32 %v788_v4, %v788_v4 }
 0x7a7   :  { %v789_v8 = vsub.f32 %v756_v48, %v784_v6  ;;  %v802_v9 = vsel %vm148_vm2, %v793_v7, 0.0 }
 0x7a8   :  { %803 = vadd.xlane.f32.xlu1 %v802_v9  ;;  %v780_v10 = vpop.xlane.xlu0 %779 }
 0x7a9   :  { %v785_v11 = vmul.f32 0.03125, %v780_v10  ;;  %v794_v12 = vmul.f32 %v789_v8, %v789_v8 }
 0x7ab   :  { %v790_v13 = vsub.f32 %v761_v52, %v785_v11  ;;  %v805_v14 = vsel %vm148_vm2, %v794_v12, 0.0 }
 0x7ac   :  { %806 = vadd.xlane.f32.xlu0 %v805_v14 }
 0x7ad   :  { %v795_v15 = vmul.f32 %v790_v13, %v790_v13 }
 0x7ae   :  { %v1553_v17 = vpop.eup %1552 }
 0x7af   :  { %v808_v16 = vsel %vm148_vm2, %v795_v15, 0.0  ;;  %v826_v19 = vmul.f32 %v1553_v17, %v786_v35 }
 0x7b0   :  { %809 = vadd.xlane.f32.xlu1 %v808_v16 }
 0x7b2   :  { %v1555_v18 = vpop.eup %1554 }
 0x7b3   :  { %v827_v20 = vmul.f32 %v1555_v18, %v787_v39 }
 0x7b5   :  { %v831_v21 = vpack.c.bf16 %v827_v20, %v826_v19 }
 0x7b7   :  { %1424 = vmatmul.mubr.msk.bf16.vlgmr.msra.gmra.mxu1 %vm148_vm2, %v831_v21 }
 0x7b8   :  { %1427 = vmatprep.mubr.msk.bf16.mxu1 %vm1575_vm0, %v1574_v0  ;;  %1436 = vmatpush3.bf16.msra.mxu1 %v1502_v22 }
 0x7b9   :  { %1437 = vmatprep.subr.bf16.mxu1 %v1574_v0 }
 0x7bc   :  { %1438 = vmatpush3.bf16.msra.mxu1 %v1503_v23 }
 0x7bd   :  { %1439 = vmatprep.subr.bf16.mxu1 %v1574_v0 }
 0x7c0   :  { %1440 = vmatpush3.bf16.msra.mxu1 %v1504_v24 }
 0x7c1   :  { %1441 = vmatprep.subr.bf16.mxu1 %v1574_v0 }
 0x7c4   :  { %1442 = vmatpush3.bf16.msra.mxu1 %v1505_v25 }
 0x7c5   :  { %1443 = vmatprep.subr.bf16.mxu1 %v1574_v0 }
 0x7c8   :  { %1444 = vmatpush3.bf16.msra.mxu1 %v1506_v26 }
 0x7c9   :  { %1445 = vmatprep.subr.bf16.mxu1 %v1574_v0 }
 0x7cc   :  { %1446 = vmatpush3.bf16.msra.mxu1 %v1507_v27 }
 0x7cd   :  { %1447 = vmatprep.subr.bf16.mxu1 %v1574_v0 }
 0x7d0   :  { %1448 = vmatpush3.bf16.msra.mxu1 %v1508_v28 }
 0x7d1   :  { %1449 = vmatprep.subr.bf16.mxu1 %v1574_v0 }
 0x7d4   :  { %1450 = vmatpush3.bf16.msra.mxu1 %v1509_v29 }
 0x831   :  { %v804_v30 = vpop.xlane.xlu1 %803 }
 0x832   :  { %v813_v31 = vmul.f32 0.03125, %v804_v30  ;;  %v1240_v30 = vld [vmem:[%s1906_s2 + $0x2a] ss:$0 sm:$0xff] }
 0x834   :  { %v818_v32 = vadd.f32 1e-05, %v813_v31 }
 0x835   :  { %v807_v33 = vpop.xlane.xlu0 %806 }
 0x836   :  { %v814_v34 = vmul.f32 0.03125, %v807_v33  ;;  %1556 = vrsqrt.f32 %v818_v32 }
 0x838   :  { %v819_v35 = vadd.f32 1e-05, %v814_v34 }
 0x839   :  { %v810_v36 = vpop.xlane.xlu1 %809 }
 0x83a   :  { %1558 = vrsqrt.f32 %v819_v35  ;;  %v815_v37 = vmul.f32 0.03125, %v810_v36 }
 0x83c   :  { %v820_v38 = vadd.f32 1e-05, %v815_v37  ;;  %v1510_v37 = vld [vmem:[%s1910_s6 + $0x8] sm:$0xff]  }
 0x83d   :  { %1464 = vmatpush3.bf16.msra.mxu0 %v1510_v37 }
 0x83e   :  { %1560 = vrsqrt.f32 %v820_v38  ;;  %1465 = vmatprep.subr.bf16.mxu0 %v1574_v0 }
 0x843   :  { %v1557_v39 = vpop.eup %1556 }
 0x844   :  { %v828_v41 = vmul.f32 %v1557_v39, %v788_v4 }
 0x847   :  { %v1559_v40 = vpop.eup %1558 }
 0x848   :  { %v829_v42 = vmul.f32 %v1559_v40, %v789_v8 }
 0x84a   :  { %v832_v43 = vpack.c.bf16 %v829_v42, %v828_v41 }
 0x84b   :  { %v1561_v44 = vpop.eup %1560 }
 0x84c   :  { %1428 = vmatmul.mubr.msk.bf16.gmra.mxu1 %vm148_vm2, %v832_v43  ;;  %v830_v45 = vmul.f32 %v1561_v44, %v790_v13 }
 0x84d   :  { %1431 = vmatprep.mubr.msk.bf16.mxu1 %vm1575_vm0, %v1574_v0 }
 0x84e   :  { %v833_v46 = vpack.c.bf16 %v830_v45, %v830_v45 }
 0x854   :  { %1432 = vmatmul.mubr.msk.bf16.gmra.mxu1 %vm148_vm2, %v833_v46 }
 0x855   :  { %1451 = vmatprep.mubr.msk.bf16.mxu1 %vm1575_vm0, %v1574_v0 }
 0x877   :  { %v899_v48 = vpop.f32.mrf.mxu1 }
 0x878   :  { %v900_v49 = vadd.f32 %v1218_v47, %v899_v48 }
 0x879   :  { %v1425_v50 = vpop.f32.mrf.mxu1 }
 0x87a   :  { %v926_v51 = vmul.f32 0.70710677, %v900_v49  ;;  %v921_v59 = vmul.f32 0.5, %v900_v49 }
 0x87b   :  { %v902_v52 = vpop.f32.mrf.mxu1 }
 0x87c   :  { %1562 = verf.f32 %v926_v51  ;;  %v903_v53 = vadd.f32 %v1218_v47, %v902_v52  ;;  %v1511_v51 = vld [vmem:[%s1910_s6] sm:$0xff]  }
 0x87d   :  { %v1426_v54 = vpop.f32.mrf.mxu1  ;;  %1466 = vmatpush3.bf16.msra.mxu0 %v1511_v51 }
 0x87e   :  { %v927_v55 = vmul.f32 0.70710677, %v903_v53  ;;  %v922_v60 = vmul.f32 0.5, %v903_v53 }
 0x880   :  { %1564 = verf.f32 %v927_v55 }
 0x889   :  { %v1563_v56 = vpop.eup %1562 }
 0x88a   :  { %v936_v57 = vadd.f32 1.0, %v1563_v56 }
 0x88c   :  { %v941_v62 = vmul.f32 %v936_v57, %v921_v59  ;;  %v1249_v57 = vld [vmem:[%s1909_s3 + $0x3] ss:$0 sm:$0xff] }
 0x88d   :  { %v1565_v58 = vpop.eup %1564 }
 0x88e   :  { %v937_v61 = vadd.f32 1.0, %v1565_v58 }
 0x890   :  { %v942_v63 = vmul.f32 %v937_v61, %v922_v60 }
 0x892   :  { %v946_v1 = vpack.c.bf16 %v942_v63, %v941_v62 }
 0x894   :  { %1452 = vmatmul.mubr.bf16.vlgmr.msra.gmra.mxu1 %v946_v1 }
 0x895   :  { %1455 = vmatprep.mubr.msk.bf16.mxu1 %vm1575_vm0, %v1574_v0 }
 0x90c   :  { %v907_v2 = vpop.f32.mrf.mxu1 }
 0x90d   :  { %v908_v3 = vadd.f32 %v1218_v47, %v907_v2 }
 0x90e   :  { %v1429_v4 = vpop.f32.mrf.mxu1 }
 0x90f   :  { %v928_v5 = vmul.f32 0.70710677, %v908_v3  ;;  %v923_v19 = vmul.f32 0.5, %v908_v3 }
 0x910   :  { %v910_v6 = vpop.f32.mrf.mxu1 }
 0x911   :  { %1566 = verf.f32 %v928_v5  ;;  %v911_v7 = vadd.f32 %v1218_v47, %v910_v6 }
 0x912   :  { %v1430_v8 = vpop.f32.mrf.mxu1 }
 0x913   :  { %v929_v9 = vmul.f32 0.70710677, %v911_v7  ;;  %v924_v20 = vmul.f32 0.5, %v911_v7 }
 0x914   :  { %v915_v10 = vpop.f32.mrf.mxu1 }
 0x915   :  { %1568 = verf.f32 %v929_v9  ;;  %v916_v11 = vadd.f32 %v1218_v47, %v915_v10 }
 0x916   :  { %v1433_v12 = vpop.f32.mrf.mxu1 }
 0x917   :  { %v930_v13 = vmul.f32 0.70710677, %v916_v11  ;;  %v925_v27 = vmul.f32 0.5, %v916_v11 }
 0x918   :  { %v918_v14 = vpop.f32.mrf.mxu1 }
 0x919   :  { %1570 = verf.f32 %v930_v13 }
 0x91a   :  { %v1434_v15 = vpop.f32.mrf.mxu1 }
 0x91e   :  { %v1567_v16 = vpop.eup %1566 }
 0x91f   :  { %v938_v17 = vadd.f32 1.0, %v1567_v16 }
 0x921   :  { %v943_v22 = vmul.f32 %v938_v17, %v923_v19 }
 0x922   :  { %v1569_v18 = vpop.eup %1568 }
 0x923   :  { %v939_v21 = vadd.f32 1.0, %v1569_v18 }
 0x925   :  { %v944_v23 = vmul.f32 %v939_v21, %v924_v20 }
 0x926   :  { %v1571_v24 = vpop.eup %1570 }
 0x927   :  { %v947_v25 = vpack.c.bf16 %v944_v23, %v943_v22  ;;  %v940_v26 = vadd.f32 1.0, %v1571_v24 }
 0x929   :  { %1456 = vmatmul.mubr.bf16.gmra.mxu1 %v947_v25  ;;  %v945_v28 = vmul.f32 %v940_v26, %v925_v27 }
 0x92a   :  { %1459 = vmatprep.mubr.msk.bf16.mxu1 %vm1575_vm0, %v1574_v0 }
 0x92b   :  { %v948_v29 = vpack.c.bf16 %v945_v28, %v945_v28 }
 0x931   :  { %1460 = vmatmul.mubr.bf16.gmra.mxu1 %v948_v29 }
 0x954   :  { %v1053_v31 = vpop.f32.mrf.mxu1 }
 0x955   :  { %v1054_v32 = vadd.f32 %v1240_v30, %v1053_v31 }
 0x956   :  { %v1453_v33 = vpop.f32.mrf.mxu1 }
 0x957   :  { %v1071_v34 = vsel %vm148_vm2, %v1054_v32, 0.0 }
 0x958   :  { %1072 = vadd.xlane.f32.xlu0 %v1071_v34  ;;  %v1056_v35 = vpop.f32.mrf.mxu1 }
 0x95a   :  { %v1454_v36 = vpop.f32.mrf.mxu1 }
 0x9e1   :  { %v1073_v38 = vpop.xlane.xlu0 %1072 }
 0x9e2   :  { %v1074_v39 = vmul.f32 0.03125, %v1073_v38 }
 0x9e4   :  { %v1075_v40 = vsub.f32 %v1054_v32, %v1074_v39 }
 0x9e6   :  { %v1076_v41 = vmul.f32 %v1075_v40, %v1075_v40 }
 0x9e8   :  { %v1077_v42 = vsel %vm148_vm2, %v1076_v41, 0.0 }
 0x9e9   :  { %1078 = vadd.xlane.f32.xlu1 %v1077_v42  ;;  %v1060_v43 = vpop.f32.mrf.mxu1 }
 0x9eb   :  { %v1457_v44 = vpop.f32.mrf.mxu1 }
 0x9ed   :  { %v1062_v45 = vpop.f32.mrf.mxu1 }
 0x9ef   :  { %v1458_v46 = vpop.f32.mrf.mxu1 }
 0x9f1   :  { %v1066_v47 = vpop.f32.mrf.mxu1 }
 0x9f3   :  { %v1461_v48 = vpop.f32.mrf.mxu1 }
 0x9f5   :  { %v1068_v49 = vpop.f32.mrf.mxu1 }
 0x9f7   :  { %v1462_v50 = vpop.f32.mrf.mxu1 }
 0xa72   :  { %v1079_v0 = vpop.xlane.xlu1 %1078 }
 0xa73   :  { %v1080_v52 = vmul.f32 0.03125, %v1079_v0 }
 0xa75   :  { %v1081_v53 = vadd.f32 1e-05, %v1080_v52 }
 0xa77   :  { %1572 = vrsqrt.f32 %v1081_v53 }
 0xa84   :  { %v1573_v54 = vpop.eup %1572 }
 0xa85   :  { %v1083_v55 = vmul.f32 %v1573_v54, %v1075_v40 }
 0xa87   :  { %v1084_v56 = vpack.c.bf16 %v1083_v55, %v1083_v55 }
 0xa89   :  { %1468 = vmatmul.mubr.msk.bf16.vlgmr.msra.gmra.mxu0 %vm148_vm2, %v1084_v56 }
 0xb49   :  { %v1143_v58 = vpop.f32.mrf.mxu0 }
 0xb4a   :  { %v1144_v59 = vadd.f32 %v1249_v57, %v1143_v58 }
 0xb4b   :  { %v1469_v60 = vpop.f32.mrf.mxu0 }
 0xb4c   :  { %1149 = vst [vmem:[%s1911_s7] sm:$0xff] %v1144_v59 }
 0xb4d   :  { %v1146_v61 = vpop.f32.mrf.mxu0 }
 0xb4f   :  { %v1470_v62 = vpop.f32.mrf.mxu0 }

</bundles_post_ra>
